<compile_context>
chip_gen: v7x
topology: tpu7x:2x2x1
jax: 0.10.0
libtpu: 0.0.40
codegen_flags: <defaults>
</compile_context>

<pallas_src>
import functools

import jax
import jax.numpy as jnp
from jax.experimental import pallas as pl
from jax.experimental.pallas import tpu as pltpu

BN_EPS = 1e-5


# ----------------------------------------------------------------------------
# hardware-aware budgets
# ----------------------------------------------------------------------------

def _vmem_capacity_bytes():
    try:
        info = pltpu.get_tpu_info()
        cap = getattr(info, "vmem_capacity_bytes", None)
        if cap:
            return int(cap)
    except Exception:
        pass
    return 64 << 20  # conservative fallback == v7x per-core VMEM


def _budgets():
    """Returns (max_x_tile_bytes, vmem_limit_bytes) per generation."""
    cap = _vmem_capacity_bytes()
    if cap >= (96 << 20):          # v5e / v6e: 128 MiB physical VMEM
        return 16 << 20, 64 << 20
    return 6 << 20, 44 << 20       # v7x: 64 MiB per TensorCore


def _round_up(v, m):
    return ((v + m - 1) // m) * m


def _pick_batch_block(n, c, itemsize, max_tile_bytes):
    """Largest batch block whose minimum x tile (bn, C, 128) fits the budget;
    must be N itself or a multiple of 8 dividing N (sublane rule on the
    partial-sum output block)."""
    if n * c * itemsize * 128 <= max_tile_bytes:
        return n
    bn = (n // 8) * 8
    while bn >= 8:
        if n % bn == 0 and bn * c * itemsize * 128 <= max_tile_bytes:
            return bn
        bn -= 8
    # TODO(synk): pathological shapes (huge C with N not a multiple of 8)
    # would need batch padding; fall back to the full batch.
    return n


def _pick_hw_chunk(hw, num_shards, bn, c, itemsize, max_tile_bytes):
    """Spatial chunk: multiple of 128 lanes, tile (bn, C, chunk) under budget,
    no larger than one shard's (rounded-up) share of HW."""
    per_col = max(1, bn * c * itemsize)
    cap = max(128, (max_tile_bytes // per_col) // 128 * 128)
    shard = -(-hw // num_shards)
    shard_128 = _round_up(shard, 128)
    return max(128, min(cap, shard_128))


# ----------------------------------------------------------------------------
# kernel 1: streaming pooled partial sums (the HBM-bound part)
# ----------------------------------------------------------------------------

def pool_sum_kernel(x_ref, out_ref, acc_ref):
    s = pl.program_id(2)

    @pl.when(s == 0)
    def _():
        acc_ref[...] = jnp.zeros_like(acc_ref)

    # x block is (bn, C, hw_chunk): spatial on lanes -> XLU lane reduce.
    # Accumulate in f32 regardless of the streamed dtype.
    acc_ref[...] += jnp.sum(x_ref[...].astype(jnp.float32), axis=-1)

    @pl.when(s == pl.num_programs(2) - 1)
    def _():
        out_ref[...] = acc_ref[...][None]


def _pooled_partial_sums(x3, *, num_shards, hw_chunk, bn, vmem_limit):
    N, C, HW_pad = x3.shape
    steps = HW_pad // (num_shards * hw_chunk)
    nb = N // bn

    cost = pl.CostEstimate(
        flops=int(N) * int(C) * int(HW_pad),
        transcendentals=0,
        bytes_accessed=int(x3.size) * int(x3.dtype.itemsize)
        + int(num_shards) * int(N) * int(C) * 4,
    )

    return pl.pallas_call(
        pool_sum_kernel,
        out_shape=jax.ShapeDtypeStruct((num_shards, N, C), jnp.float32),
        grid_spec=pltpu.PrefetchScalarGridSpec(
            num_scalar_prefetch=0,
            grid=(num_shards, nb, steps),
            in_specs=[
                # stream x: each shard p walks its own contiguous HW range
                pl.BlockSpec((bn, C, hw_chunk),
                             lambda p, b, s: (b, 0, p * steps + s)),
            ],
            # one (N, C) partial-sum slab per shard; resident across s
            out_specs=pl.BlockSpec((1, bn, C), lambda p, b, s: (p, b, 0)),
            scratch_shapes=[pltpu.VMEM((bn, C), jnp.float32)],
        ),
        compiler_params=pltpu.CompilerParams(
            # shard + batch axes are independent (megacore on v7x),
            # the HW axis is the reduction
            dimension_semantics=("parallel", "parallel", "arbitrary"),
            vmem_limit_bytes=vmem_limit,
        ),
        cost_estimate=cost,
    )(x3)


# ----------------------------------------------------------------------------
# kernel 2: tiny epilogue (merge partials, fc1, BN, ReLU, fused heads)
# ----------------------------------------------------------------------------

def head_kernel(part_ref, w1_ref, b1_ref, gamma_ref, beta_ref, wh_ref, bh_ref,
                out_ref, *, inv_hw):
    pooled = jnp.sum(part_ref[...], axis=0) * inv_hw                 # (N, C)

    h = jnp.dot(pooled, w1_ref[...],
                preferred_element_type=jnp.float32) + b1_ref[...]    # (N, Hd)

    # BatchNorm1d, training-mode batch statistics (biased variance, eps=1e-5).
    # TODO(synk): PyTorch raises for N==1 in train mode; here the output would
    # collapse to beta (var==0) instead of erroring.
    mean = jnp.mean(h, axis=0, keepdims=True)
    centered = h - mean
    var = jnp.mean(centered * centered, axis=0, keepdims=True)
    h = centered * jax.lax.rsqrt(var + BN_EPS)
    h = h * gamma_ref[...] + beta_ref[...]

    h = jnp.maximum(h, 0.0)

    # fused cls|box heads -> one lane-dense (padded) output slab
    out_ref[...] = jnp.dot(h, wh_ref[...],
                           preferred_element_type=jnp.float32) + bh_ref[...]


def _heads(partials, pp, inv_hw, vmem_limit):
    P, N, C = partials.shape
    Hd = pp["w1"].shape[1]
    out_pad = pp["out_pad"]

    kernel = functools.partial(head_kernel, inv_hw=inv_hw)

    cost = pl.CostEstimate(
        flops=2 * N * C * Hd + 2 * N * Hd * out_pad + 10 * N * Hd,
        transcendentals=int(Hd),
        bytes_accessed=4 * (int(partials.size) + C * Hd + Hd * out_pad
                            + 4 * Hd + out_pad + N * out_pad),
    )

    return pl.pallas_call(
        kernel,
        out_shape=jax.ShapeDtypeStruct((N, out_pad), jnp.float32),
        grid_spec=pltpu.PrefetchScalarGridSpec(
            num_scalar_prefetch=0,
            grid=(1,),
            in_specs=[
                pl.BlockSpec((P, N, C), lambda i: (0, 0, 0)),
                pl.BlockSpec((C, Hd), lambda i: (0, 0)),
                pl.BlockSpec((1, Hd), lambda i: (0, 0)),
                pl.BlockSpec((1, Hd), lambda i: (0, 0)),
                pl.BlockSpec((1, Hd), lambda i: (0, 0)),
                pl.BlockSpec((Hd, out_pad), lambda i: (0, 0)),
                pl.BlockSpec((1, out_pad), lambda i: (0, 0)),
            ],
            out_specs=pl.BlockSpec((N, out_pad), lambda i: (0, 0)),
        ),
        compiler_params=pltpu.CompilerParams(
            dimension_semantics=("arbitrary",),
            vmem_limit_bytes=min(vmem_limit, 32 << 20),
        ),
        cost_estimate=cost,
    )(partials, pp["w1"], pp["b1"], pp["gamma"], pp["beta"], pp["wh"], pp["bh"])


# ----------------------------------------------------------------------------
# wrapper / params
# ----------------------------------------------------------------------------

def prepare_params(raw_params):
    """One-time parameter preprocessing: fuse the two heads into a single
    (Hd, 5K) weight zero-padded to a multiple of 128 lanes."""
    w1, b1, gamma, beta, wc, bc, wb, bb = raw_params
    num_classes = wc.shape[1]
    out_dim = num_classes * 5
    out_pad = _round_up(out_dim, 128)
    Hd = w1.shape[1]

    wh = jnp.zeros((Hd, out_pad), jnp.float32).at[:, :out_dim].set(
        jnp.concatenate([wc, wb], axis=1))
    bh = jnp.zeros((1, out_pad), jnp.float32).at[:, :out_dim].set(
        jnp.concatenate([bc, bb], axis=1))
    return dict(w1=w1, b1=b1, gamma=gamma, beta=beta, wh=wh, bh=bh,
                num_classes=num_classes, out_dim=out_dim, out_pad=out_pad)


def fast_predictor(x_nchw, pp, *, hw_chunk=None, num_shards=None):
    """x_nchw: (N, C, H, W). Returns (cls (N, K), box (N, 4K))."""
    N, C, H, W = x_nchw.shape
    HW = H * W
    itemsize = x_nchw.dtype.itemsize

    max_tile_bytes, vmem_limit = _budgets()

    if num_shards is None:
        num_shards = 2 if HW >= 256 else 1   # dual-TC split worth it (v7x)

    bn = _pick_batch_block(N, C, itemsize, max_tile_bytes)

    if hw_chunk is None:
        hw_chunk = _pick_hw_chunk(HW, num_shards, bn, C, itemsize,
                                  max_tile_bytes)
    assert hw_chunk % 128 == 0, "hw_chunk must be a multiple of 128"

    steps = -(-HW // (num_shards * hw_chunk))
    hw_pad = num_shards * steps * hw_chunk

    # Free view of NCHW; no relayout of the streamed tensor.
    x3 = x_nchw.reshape(N, C, HW)
    if hw_pad != HW:
        # Zero padding does not change the spatial sum; we divide by true HW.
        # TODO(synk): producers emitting HW as a multiple of 128 avoid this copy.
        x3 = jnp.pad(x3, ((0, 0), (0, 0), (0, hw_pad - HW)))

    partials = _pooled_partial_sums(
        x3, num_shards=num_shards, hw_chunk=hw_chunk, bn=bn,
        vmem_limit=vmem_limit)

    out = _heads(partials, pp, 1.0 / float(HW), vmem_limit)

    K = pp["num_classes"]
    return out[:, :K], out[:, K:pp["out_dim"]]


def init_params(key, num_classes, in_channels, hidden_channels):
    """Deterministic synthetic init mirroring the module's __init__ shapes.

    Linear weights: kaiming_normal_(mode='fan_out', nonlinearity='relu')
      -> std = sqrt(2 / out_features); biases = 0.
    BatchNorm1d default init: weight=1, bias=0.
    Weights stored transposed as (in_features, out_features).
    """
    k1, k2, k3 = jax.random.split(key, 3)
    std1 = (2.0 / hidden_channels) ** 0.5
    stdc = (2.0 / num_classes) ** 0.5
    stdb = (2.0 / (num_classes * 4)) ** 0.5

    w1 = jax.random.normal(k1, (in_channels, hidden_channels), jnp.float32) * std1
    b1 = jnp.zeros((1, hidden_channels), jnp.float32)
    gamma = jnp.ones((1, hidden_channels), jnp.float32)
    beta = jnp.zeros((1, hidden_channels), jnp.float32)
    wc = jax.random.normal(k2, (hidden_channels, num_classes), jnp.float32) * stdc
    bc = jnp.zeros((1, num_classes), jnp.float32)
    wb = jax.random.normal(k3, (hidden_channels, num_classes * 4), jnp.float32) * stdb
    bb = jnp.zeros((1, num_classes * 4), jnp.float32)
    return (w1, b1, gamma, beta, wc, bc, wb, bb)


def fast_predictor_ref(x_nchw, raw_params):
    """Pure-JAX reference for correctness checking."""
    w1, b1, gamma, beta, wc, bc, wb, bb = raw_params
    pooled = jnp.mean(x_nchw, axis=(2, 3))
    h = pooled @ w1 + b1
    mean = jnp.mean(h, axis=0, keepdims=True)
    var = jnp.mean((h - mean) ** 2, axis=0, keepdims=True)
    h = (h - mean) / jnp.sqrt(var + BN_EPS) * gamma + beta
    h = jnp.maximum(h, 0.0)
    return h @ wc + bc, h @ wb + bb


if __name__ == "__main__":
    # Small shapes consistent with the module: batch=2, in_channels=4,
    # spatial=16x16, hidden_channels=32, num_classes=3.
    N, C, H, W = 2, 4, 16, 16
    hidden_channels, num_classes = 32, 3

    key = jax.random.PRNGKey(0)
    kx, kp, kx2 = jax.random.split(key, 3)
    x = jax.random.normal(kx, (N, C, H, W), jnp.float32)
    raw = init_params(kp, num_classes, C, hidden_channels)
    packed = prepare_params(raw)   # one-time head fusion / lane padding

    cls_ref, box_ref = fast_predictor_ref(x, raw)

    # 1) default path: HW=256 -> 2 shards x 1 step of 128 lanes each
    cls_out, box_out = fast_predictor(x, packed)
    cls_out = jax.block_until_ready(cls_out)
    box_out = jax.block_until_ready(box_out)
    assert cls_out.shape == (N, num_classes)
    assert box_out.shape == (N, num_classes * 4)
    assert jnp.allclose(cls_out, cls_ref, atol=2e-4, rtol=1e-4)
    assert jnp.allclose(box_out, box_ref, atol=2e-4, rtol=1e-4)

    # 2) force multi-step accumulation on a single shard (grid steps = 2)
    cls_out2, box_out2 = fast_predictor(x, packed, hw_chunk=128, num_shards=1)
    cls_out2 = jax.block_until_ready(cls_out2)
    box_out2 = jax.block_until_ready(box_out2)
    assert jnp.allclose(cls_out2, cls_ref, atol=2e-4, rtol=1e-4)
    assert jnp.allclose(box_out2, box_ref, atol=2e-4, rtol=1e-4)

    # 3) exercise the HW zero-padding path (13x13 = 169, not a multiple of 128)
    x2 = jax.random.normal(kx2, (N, C, 13, 13), jnp.float32)
    cls3_ref, box3_ref = fast_predictor_ref(x2, raw)
    cls_out3, box_out3 = fast_predictor(x2, packed)
    cls_out3 = jax.block_until_ready(cls_out3)
    box_out3 = jax.block_until_ready(box_out3)
    assert jnp.allclose(cls_out3, cls3_ref, atol=2e-4, rtol=1e-4)
    assert jnp.allclose(box_out3, box3_ref, atol=2e-4, rtol=1e-4)

    print("KERNEL_OK")
</pallas_src>

<mosaic_0001>
module attributes {stable_mosaic.version = 11 : i64} {
  func.func @pool_sum_kernel(%arg0: i32, %arg1: i32, %arg2: i32, %arg3: memref<2x4x128xf32, #tpu.memory_space<vmem>>, %arg4: memref<1x2x4xf32, #tpu.memory_space<vmem>>, %arg5: memref<2x4xf32, #tpu.memory_space<vmem>>) attributes {dimension_semantics = [#tpu.dimension_semantics<parallel>, #tpu.dimension_semantics<parallel>, #tpu.dimension_semantics<arbitrary>], iteration_bounds = array<i64: 2, 1, 1>, scalar_prefetch = 0 : i64, scratch_operands = 1 : i64, tpu.core_type = #tpu.core_type<tc>, window_params = [{transform_indices = @transform_0, window_bounds = array<i64: 2, 4, 128>}, {transform_indices = @transform_1, window_bounds = array<i64: 1, 2, 4>}]} {
    %c0_i32 = arith.constant 0 : i32
    %0 = arith.cmpi eq, %arg2, %c0_i32 : i32
    %1 = arith.extui %0 : i1 to i32
    %c0_i32_0 = arith.constant 0 : i32
    %2 = arith.cmpi ne, %1, %c0_i32_0 : i32
    scf.if %2 {
      %cst_9 = arith.constant 0.000000e+00 : f32
      %11 = vector.broadcast %cst_9 : f32 to vector<2x4xf32>
      %c0_10 = arith.constant 0 : index
      %c0_11 = arith.constant 0 : index
      %12 = vector.load %arg5[%c0_10, %c0_11] : memref<2x4xf32, #tpu.memory_space<vmem>>, vector<2x4xf32>
      tpu.vector_store %arg5[%c0_10, %c0_11], %11 {strides = array<i32>} : memref<2x4xf32, #tpu.memory_space<vmem>>, vector<2x4xf32>,
    } else {
    }
    %c0 = arith.constant 0 : index
    %c0_1 = arith.constant 0 : index
    %3 = vector.load %arg5[%c0, %c0_1] : memref<2x4xf32, #tpu.memory_space<vmem>>, vector<2x4xf32>
    %c0_2 = arith.constant 0 : index
    %c0_3 = arith.constant 0 : index
    %c0_4 = arith.constant 0 : index
    %4 = vector.load %arg3[%c0_2, %c0_3, %c0_4] : memref<2x4x128xf32, #tpu.memory_space<vmem>>, vector<2x4x128xf32>
    %cst = arith.constant dense<0.000000e+00> : vector<2x4xf32>
    %5 = vector.multi_reduction <add>, %4, %cst [2] : vector<2x4x128xf32> to vector<2x4xf32>
    %6 = arith.addf %3, %5 : vector<2x4xf32>
    %c0_5 = arith.constant 0 : index
    %c0_6 = arith.constant 0 : index
    %7 = vector.load %arg5[%c0_5, %c0_6] : memref<2x4xf32, #tpu.memory_space<vmem>>, vector<2x4xf32>
    tpu.vector_store %arg5[%c0_5, %c0_6], %6 {strides = array<i32>} : memref<2x4xf32, #tpu.memory_space<vmem>>, vector<2x4xf32>,
    %c0_i32_7 = arith.constant 0 : i32
    %8 = arith.cmpi eq, %arg2, %c0_i32_7 : i32
    %9 = arith.extui %8 : i1 to i32
    %c0_i32_8 = arith.constant 0 : i32
    %10 = arith.cmpi ne, %9, %c0_i32_8 : i32
    scf.if %10 {
      %c0_9 = arith.constant 0 : index
      %c0_10 = arith.constant 0 : index
      %11 = vector.load %arg5[%c0_9, %c0_10] : memref<2x4xf32, #tpu.memory_space<vmem>>, vector<2x4xf32>
      %12 = vector.shape_cast %11 : vector<2x4xf32> to vector<1x2x4xf32>
      %c0_11 = arith.constant 0 : index
      %c0_12 = arith.constant 0 : index
      %c0_13 = arith.constant 0 : index
      %13 = vector.load %arg4[%c0_11, %c0_12, %c0_13] : memref<1x2x4xf32, #tpu.memory_space<vmem>>, vector<1x2x4xf32>
      tpu.vector_store %arg4[%c0_11, %c0_12, %c0_13], %12 {strides = array<i32>} : memref<1x2x4xf32, #tpu.memory_space<vmem>>, vector<1x2x4xf32>,
    } else {
    }
    return
  }
  func.func @transform_0(%arg0: i32, %arg1: i32, %arg2: i32) -> (i32, i32, i32) {
    %c1_i32 = arith.constant 1 : i32
    %0 = arith.muli %arg0, %c1_i32 : i32
    %1 = arith.addi %0, %arg2 : i32
    %c0_i32 = arith.constant 0 : i32
    %c0_i32_0 = arith.constant 0 : i32
    return %arg1, %c0_i32, %1 : i32, i32, i32
  }
  func.func @transform_1(%arg0: i32, %arg1: i32, %arg2: i32) -> (i32, i32, i32) {
    %c0_i32 = arith.constant 0 : i32
    %c0_i32_0 = arith.constant 0 : i32
    return %arg0, %arg1, %c0_i32 : i32, i32, i32
  }
}

</mosaic_0001>

<bundles_post_ra>
// kernel: tpu_custom_call.1
= control target key start
LH: loop header
LB: loop body
LE: loop exit
PB: predicated region body
PF: predicated region fallthrough
CT: control target
= control target key end

     0   :  { %6 = vsyncpa [#allocation4], 0  ;;  %s688_s0 = inlined_call_operand.hbm [shape: f32[2,4,256], index: 0, kind: input, shape index: {}]   ;;  %s689_s1 = inlined_call_operand.hbm [shape: f32[2,2,4], index: 1, kind: output, shape index: {}]  }
   0x1   :  { %8 = vsyncpa [#allocation4 + $0x1], 0 }
   0x2   :  { %9 = vsyncpa [#allocation5], 0 }
   0x3   :  { %11 = vsyncpa [#allocation5 + $0x1], 0  ;;  %s513_s6 = smov 0   ;;  %s515_s7 = smov 0  }
   0x4   :  { %s517_s8 = smov 0   ;;  %s519_s9 = smov 0  }
   0x5   :  { %s521_s10 = smov 0   ;;  %s523_s11 = smov 0  }
   0x6 LB: > { %s304_s12 = sadd.s32 4294967295, %s495_s11   ;;  %s305_s13 = sadd.s32 4294967294, %s495_s11   ;;  %s495_s11 = sphi %s523_s11, %s17_s11   ;;  %s491_s10 = sphi %s521_s10, %s703_s10   ;;  %s487_s9 = sphi %s519_s9, %s702_s9   ;;  %s483_s8 = sphi %s517_s8, %s701_s8   ;;  %s479_s7 = sphi %s515_s7, %s700_s7   ;;  %s475_s6 = sphi %s513_s6, %s699_s6  }
   0x7   : > { %s36_s14 = sadd.s32 1, %s491_s10  ;;  %s47_s15 = sadd.s32 1, %s483_s8 }
   0x8   : > { %p38_p0 = scmp.ge.s32.totalorder %s36_s14, 2  ;;  %p54_p1 = scmp.ne.s32.totalorder %s483_s8, %s479_s7 }
   0x9   : > { %p55_p2 = scmp.eq.s32.totalorder %s495_s11, 0  ;;  %p60_p3 = scmp.ne.s32.totalorder %s479_s7, %s475_s6 }
   0xa   : > { %s705_s14 = smov (%p38_p0, %s36_s14), 0  ;;  %p61_p5 = scmp.eq.s32.totalorder %s304_s12, 0 }
   0xb   : > { %p554_p4 = por %p55_p2, %p54_p1  ;;  %s43_s17 = ssub.s32 %s491_s10, %s705_s14 }
   0xc   : > { %p86_p6 = scmp.eq.s32.totalorder %s304_s12, 1  ;;  %p45_p7 = scmp.eq.s32.totalorder %s43_s17, 0 }
   0xd   : > { %p560_p8 = por %p61_p5, %p60_p3  ;;  %p92_p10 = scmp.eq.s32.totalorder %s305_s13, 1 }
   0xe   : > { %p564_p9 = por %p86_p6, %p54_p1  ;;  %p329_p13 = scmp.lt.s32.totalorder %s495_s11, 2 }
   0xf   : > { %s569_s20 = scalar_select %p45_p7, %s483_s8, %s47_s15  }
  0x10   : > { %s693_s19 = scalar_select %p564_p9, 1, 0 }
  0x11   : > { %p571_p11 = por %p92_p10, %p60_p3  ;;  %s112_s22 = sand.u32 1, %s483_s8  }
  0x12   : > { %s308_s23 = sshll.u32 %s112_s22, 3  ;;  %s309_s24 = sshll.u32 %s491_s10, 6 }
  0x13   : > { %s694_s21 = scalar_select %p571_p11, 1, 0 }
  0x14   : > { %s582_s27 = scalar_lea.hbm %s688_s0, %s309_s24  ;;  %s116_s28 = scalar_lea.vmem [#allocation3], %s308_s23 }
  0x15   : > { %s126_s29 = sshll.u32 %s116_s28, 4  ;;  %p588_p0 = pnand %p329_p13, %p554_p4  ;;  %s584_s29 = int_to_ptr.vmem [resolvable:$true] %s126_s29 }
  0x16   : > { %s592_s2 = scalar_lea.sflag [#allocation4], %s112_s22  ;;  %s383_s3 = scalar_lea.hbm %s582_s27, 128 }
  0x17   : > { %p384_p1 = scmp.ne.s32.totalorder %s582_s27, %s383_s3  ;;  %p385_p2 = pneg %p588_p0 }
  0x18   : > { %s388_s12 = scalar_lea.hbm %s688_s0, 256  ;;  %p389_p4 = scmp.lt.u32.totalorder %s582_s27, %s688_s0 }
  0x19   : > { %p386_p3 = pnand %p385_p2, %p384_p1  ;;  %p390_p6 = scmp.lt.u32.totalorder %s388_s12, %s383_s3 }
  0x1a   : > { %p392_p10 = scmp.lt.u32.totalorder %s383_s3, %s582_s27 }
  0x1b   : > { %p387_p5 = pneg %p386_p3  ;;  %p391_p7 = por %p390_p6, %p389_p4 }
  0x1d   : > { %p393_p13 = por %p392_p10, %p391_p7 }
  0x1f   : > { %p394_p12 = pnand %p393_p13, %p387_p5 }
  0x21   : > { %397 = shalt.err (!%p394_p12)
}
  0x22   : > { %s398_s16 = scalar_lea.vmem %s584_s29, 128  ;;  %s497_s17 = smov [#allocation3]  }
  0x23   : > { %p399_p1 = scmp.ne.s32.totalorder %s584_s29, %s398_s16  ;;  %s403_s22 = sshll.u32 %s497_s17, 4  ;;  %s404_s22 = int_to_ptr.vmem [resolvable:$false] %s403_s22 }
  0x24   : > { %s405_s23 = scalar_lea.vmem %s404_s22, 256  ;;  %p406_p9 = scmp.lt.s32.totalorder %s584_s29, %s404_s22 }
  0x25   : > { %p401_p3 = pnand %p399_p1, %p385_p2  ;;  %p407_p4 = scmp.lt.s32.totalorder %s405_s23, %s398_s16 }
  0x27   : > { %p402_p11 = pneg %p401_p3  ;;  %p408_p6 = por %p407_p4, %p406_p9 }
  0x29   : > { %p409_p7 = pnand %p408_p6, %p402_p11 }
  0x2b   : > { %412 = shalt.err (!%p409_p7)
}
  0x2c   : > { %s498_s24 = smov 128   ;;  %s499_s25 = smov 64  }
  0x2d   : > { %s500_s26 = smov 4   ;;  %p310_p12 = scmp.ge.s32.totalorder %s495_s11, 1 }
  0x2e   : > { %324 = dma.hbm_to_vmem [thread:$0]  (!%p588_p0), %s582_s27, 128, %s584_s29, %s592_s2, %s498_s24, %s499_s25, %s500_s26  }
  0x2f   : > { %p134_p2 = scmp.lt.s32.totalorder %s495_s11, 3 }
  0x31   : > { %p135_p5 = pnand %p310_p12, %p134_p2 }
  0x32   : > { %s623_s28 = sand.u32 (!%p135_p5), 1, %s479_s7  }
  0x33   : > { %138 = sbr.rel (%p135_p5) target bundleno = 234 (0xea), region = 24  ;;  %s311_s3 = sshll.u32 (!%p135_p5), %s623_s28, 3 }
  0x34   : > { %s141_s4 = scalar_lea.sflag (!%p135_p5), [#allocation4], %s623_s28  ;;  %s144_s5 = scalar_lea.vmem (!%p135_p5), [#allocation3], %s311_s3 }
  0x3a   : > { %466 = dma.done.wait (%p560_p8), %s141_s4, 128  }
  0x3b   : > { %468 = vsyncadd (%p560_p8), %s141_s4, 4294967168  ;;  %vm174_vm0 = vcmask 1043456   ;;  %v172_v0 = vld [vmem:[%s144_s5] sm:$0xf]  ;;  %v173_v1 = vld [vmem:[%s144_s5 + $0x4] sm:$0xf]  ;;  %v183_v5 = vlaneseq }
  0x3c   : > { %v175_v2 = vsel %vm174_vm0, %v172_v0, 0.0  ;;  %v178_v3 = vsel %vm174_vm0, %v173_v1, 0.0  ;;  %vm169_vm1 = vcmask 25600   ;;  %v501_v4 = vmov 0.0   ;;  %s312_s18 = sshll.u32 %s623_s28, 1  ;;  %s314_s27 = sshll.u32 %s487_s9, 5 }
  0x3d   : > { %176 = vadd.xlane.f32.xlu0 %v175_v2  ;;  %170 = vst.msk [vmem:[#allocation2] sm:$0x3] %vm169_vm1, %v501_v4  ;;  %v184_v6 = vand.u32 127, %v183_v5  ;;  %v186_v7 = vshrl.u32 %v183_v5, 7  ;;  %vm193_vm2 = vcmask 1041409   ;;  %s162_s29 = scalar_lea.vmem [#allocation6], %s312_s18  ;;  %s638_s13 = scalar_lea.hbm %s689_s1, %s314_s27 }
  0x3e   : > { %s219_s30 = sshll.u32 %s162_s29, 4  ;;  %s205_s15 = scalar_lea.sflag [#allocation5], %s623_s28  ;;  %s640_s30 = int_to_ptr.vmem [resolvable:$true] %s219_s30 }
  0x3f   : > { %v187_v9 = vsub.s32 %v184_v6, %v186_v7  ;;  %s413_s16 = scalar_lea.vmem %s640_s30, 32  ;;  %p696_p9 = scmp.ne.s32.totalorder %s693_s19, 0 }
  0x40   : > { %p414_p8 = scmp.ne.s32.totalorder %s640_s30, %s413_s16  ;;  %s502_s9 = smov [#allocation6]  }
  0x41   : > { %179 = vadd.xlane.f32.xlu0 %v178_v3  ;;  %s417_s17 = sshll.u32 %s502_s9, 4  ;;  %s418_s17 = int_to_ptr.vmem [resolvable:$false] %s417_s17 }
  0x42   : > { %p415_p11 = pnand %p414_p8, %p696_p9  ;;  %s419_s22 = scalar_lea.vmem %s418_s17, 64 }
  0x43   : > { %p420_p10 = scmp.lt.s32.totalorder %s640_s30, %s418_s17  ;;  %p421_p13 = scmp.lt.s32.totalorder %s419_s22, %s413_s16 }
  0x44   : > { %v171_v12 = vld [vmem:[#allocation2] sm:$0x3]  ;;  %p416_p0 = pneg %p415_p11 }
  0x45   : > { %p422_p1 = por %p421_p13, %p420_p10 }
  0x47   : > { %p423_p3 = pnand %p422_p1, %p416_p0 }
  0xca   : > { %v177_v8 = vpop.xlane.xlu0 %176 }
  0xcb   : > { %v188_v11 = vrot.slane %v177_v8, %v187_v9 }
  0xce   : > { %v180_v10 = vpop.xlane.xlu0 %179 }
  0xcf   : > { %v192_v13 = vrot.slane %v180_v10, %v187_v9 }
  0xd1   : > { %v194_v14 = vsel %vm193_vm2, %v192_v13, %v188_v11 }
  0xd2   : > { %v196_v15 = vadd.f32 %v194_v14, %v171_v12 }
  0xd4   : > { %198 = vst.msk [vmem:[#allocation2] sm:$0x3] %vm169_vm1, %v196_v15 }
  0xdb   : > { %v202_v16 = vld [vmem:[#allocation2] sm:$0x3] }
  0xdc   : > { %203 = vst.msk [vmem:[%s162_s29] sm:$0x3] %vm169_vm1, %v202_v16 }
  0xdd   : > { %426 = shalt.err (!%p423_p3)
}
  0xde   : > { %s427_s23 = scalar_lea.hbm %s638_s13, 32  ;;  %s431_s26 = scalar_lea.hbm %s689_s1, 64 }
  0xdf   : > { %p428_p4 = scmp.ne.s32.totalorder %s638_s13, %s427_s23  ;;  %p432_p12 = scmp.lt.u32.totalorder %s638_s13, %s689_s1 }
  0xe0   : > { %p433_p2 = scmp.lt.u32.totalorder %s431_s26, %s427_s23  ;;  %p435_p8 = scmp.lt.u32.totalorder %s427_s23, %s638_s13 }
  0xe1   : > { %p429_p6 = pnand %p428_p4, %p696_p9 }
  0xe2   : > { %p434_p5 = por %p433_p2, %p432_p12 }
  0xe3   : > { %p430_p7 = pneg %p429_p6 }
  0xe4   : > { %p436_p11 = por %p435_p8, %p434_p5 }
  0xe6   : > { %p437_p0 = pnand %p436_p11, %p430_p7 }
  0xe8   : > { %440 = shalt.err (!%p437_p0)
}
  0xe9   : > { %319 = dma.vmem_to_hbm [thread:$0]  (%p696_p9), %s640_s30, 32, %s638_s13, %s205_s15  }
  0xea PF: > { %s231_s4 = sand.u32 1, %s475_s6   ;;  %p697_p10 = scmp.ne.s32.totalorder %s694_s21, 0 }
  0xeb   : > { %p698_p13 = scmp.ge.s32.totalorder %s495_s11, 2  ;;  %s232_s5 = scalar_lea.sflag [#allocation5], %s231_s4 }
  0xed   : > { %p326_p1 = pnand %p698_p13, %p697_p10 }
  0xef   : > { %470 = dma.done.wait (!%p326_p1), %s232_s5, 32  }
  0xf0   : > { %472 = vsyncadd (!%p326_p1), %s232_s5, 4294967264  ;;  %s17_s11 = sadd.s32 1, %s495_s11   ;;  %s699_s6 = smov %s479_s7 }
  0xf1   : > { %p14_p3 = scmp.ge.s32.totalorder %s17_s11, 4   ;;  %s700_s7 = smov %s483_s8 }
  0xf2   : > { %s701_s8 = smov %s569_s20  ;;  %s702_s9 = smov %s491_s10 }
  0xf3   : > { %s703_s10 = smov %s705_s14  ;;  %16 = sbr.rel (!%p14_p3) target bundleno = 6 (0x6), region = 77 }
  0xfa   :  { %237 = vsyncpa [#allocation4], 1 }
  0xfb   :  { %239 = vsyncpa [#allocation4 + $0x1], 1 }
  0xfc   :  { %240 = vsyncpa [#allocation5], 1 }
  0xfd   :  { %242 = vsyncpa [#allocation5 + $0x1], 1 }

</bundles_post_ra>
